<compile_context>
chip_gen: v7x
topology: tpu7x:2x2x1
jax: 0.10.0
libtpu: 0.0.40
codegen_flags: <defaults>
</compile_context>

<pallas_src>
import jax
import jax.numpy as jnp
from jax.experimental import pallas as pl
from jax.experimental.pallas import tpu as pltpu

IN_DIM = 16 * 16       # 256
H1, H2 = 128, 64
OUT_DIM = 10
OUT_PAD = 16           # fc3 logits padded to 16 lanes (block last dim == array dim -> legal)


def _round_up(x, m):
    return ((x + m - 1) // m) * m


def _tile_and_vmem_budget():
    """Generation-dependent batch-tile cap and scoped-VMEM limit."""
    try:
        vmem = pltpu.get_tpu_info().vmem_capacity_bytes
    except Exception:
        vmem = 64 << 20  # conservative (v7x-safe) fallback
    if vmem >= (100 << 20):       # v5e / v6e: 128 MiB physical VMEM
        return 8192, 48 << 20
    return 4096, 40 << 20         # v7x: 64 MiB per TensorCore


def mlp_kernel(x_ref, w1_ref, b1_ref, w2_ref, b2_ref, w3_ref, b3_ref, o_ref):
    # fc1 + ReLU: bf16 operands on the MXU, f32 accumulation, f32 bias.
    h1 = jnp.dot(x_ref[...], w1_ref[...], preferred_element_type=jnp.float32)
    h1 = jnp.maximum(h1 + b1_ref[...], 0.0)
    # fc2 + ReLU
    h2 = jnp.dot(h1.astype(jnp.bfloat16), w2_ref[...],
                 preferred_element_type=jnp.float32)
    h2 = jnp.maximum(h2 + b2_ref[...], 0.0)
    # fc3 (no activation), 16-lane padded logits.
    out = jnp.dot(h2.astype(jnp.bfloat16), w3_ref[...],
                  preferred_element_type=jnp.float32)
    o_ref[...] = (out + b3_ref[...]).astype(o_ref.dtype)


def prepare_params(params):
    """One-time prep: weights -> bf16, fc3 weight/bias lane-padded to OUT_PAD (zeros past col 10)."""
    w1, b1, w2, b2, w3, b3 = params
    w3p = jnp.zeros((H2, OUT_PAD), jnp.float32).at[:, :OUT_DIM].set(w3)
    b3p = jnp.zeros((1, OUT_PAD), jnp.float32).at[:, :OUT_DIM].set(b3)
    return (w1.astype(jnp.bfloat16), b1.astype(jnp.float32),
            w2.astype(jnp.bfloat16), b2.astype(jnp.float32),
            w3p.astype(jnp.bfloat16), b3p.astype(jnp.float32))


def custom_mlp_forward(x_nchw, prepared_params):
    w1, b1, w2, b2, w3p, b3p = prepared_params
    n = x_nchw.shape[0]
    # Same as torch x.view(-1, 16*16); bf16 halves the dominant input HBM stream.
    x2d = x_nchw.reshape(n, IN_DIM).astype(jnp.bfloat16)

    max_tile_b, vmem_limit = _tile_and_vmem_budget()
    n8 = _round_up(n, 8)
    tile_b = min(max_tile_b, n8)
    # Ensure >=2 parallel grid steps so v7x's two TensorCores both get work
    # (only when the batch is big enough to be worth splitting).
    if tile_b == n8 and tile_b >= 512:
        tile_b = _round_up(tile_b // 2, 8)
    n_pad = _round_up(n, tile_b)
    if n_pad != n:
        x2d = jnp.pad(x2d, ((0, n_pad - n), (0, 0)))
    grid = (n_pad // tile_b,)

    in_specs = [
        pl.BlockSpec((tile_b, IN_DIM), lambda i: (i, 0)),   # x: tiled over batch
        pl.BlockSpec((IN_DIM, H1),     lambda i: (0, 0)),   # w1: VMEM-resident
        pl.BlockSpec((1, H1),          lambda i: (0, 0)),   # b1: resident
        pl.BlockSpec((H1, H2),         lambda i: (0, 0)),   # w2: resident
        pl.BlockSpec((1, H2),          lambda i: (0, 0)),   # b2: resident
        pl.BlockSpec((H2, OUT_PAD),    lambda i: (0, 0)),   # w3 (padded): resident
        pl.BlockSpec((1, OUT_PAD),     lambda i: (0, 0)),   # b3 (padded): resident
    ]
    out_spec = pl.BlockSpec((tile_b, OUT_PAD), lambda i: (i, 0))

    flops = 2 * n_pad * (IN_DIM * H1 + H1 * H2 + H2 * OUT_DIM)
    bytes_accessed = (
        n_pad * IN_DIM * 2                      # bf16 x in
        + n_pad * OUT_PAD * 4                   # f32 logits out
        + (IN_DIM * H1 + H1 * H2 + H2 * OUT_PAD) * 2   # bf16 weights
        + (H1 + H2 + OUT_PAD) * 4               # f32 biases
    )

    out = pl.pallas_call(
        mlp_kernel,
        out_shape=jax.ShapeDtypeStruct((n_pad, OUT_PAD), jnp.float32),
        grid=grid,
        in_specs=in_specs,
        out_specs=out_spec,
        compiler_params=pltpu.CompilerParams(
            dimension_semantics=("parallel",),
            vmem_limit_bytes=vmem_limit,
        ),
        cost_estimate=pl.CostEstimate(
            flops=flops, transcendentals=0, bytes_accessed=bytes_accessed
        ),
    )(x2d, w1, b1, w2, b2, w3p, b3p)

    # Only touches (n, 16) here; padded rows/lanes discarded.
    return out[:n, :OUT_DIM]


def init_params(key):
    """Deterministic init matching the nn.Linear shapes (stored transposed), f32."""
    ks = jax.random.split(key, 6)

    def uniform(k, shape, fan_in):
        bound = 1.0 / jnp.sqrt(fan_in)
        return jax.random.uniform(k, shape, jnp.float32, -bound, bound)

    w1 = uniform(ks[0], (IN_DIM, H1), IN_DIM)   # fc1.weight.T
    b1 = uniform(ks[1], (1, H1), IN_DIM)        # fc1.bias
    w2 = uniform(ks[2], (H1, H2), H1)           # fc2.weight.T
    b2 = uniform(ks[3], (1, H2), H1)            # fc2.bias
    w3 = uniform(ks[4], (H2, OUT_DIM), H2)      # fc3.weight.T
    b3 = uniform(ks[5], (1, OUT_DIM), H2)       # fc3.bias
    return (w1, b1, w2, b2, w3, b3)


if __name__ == "__main__":
    key = jax.random.PRNGKey(0)
    k_x, k_p = jax.random.split(key)

    # Small batch of NCHW images consistent with the 16*16 flatten in forward().
    x = jax.random.normal(k_x, (2, 1, 16, 16), dtype=jnp.float32)
    params = init_params(k_p)
    prepared = prepare_params(params)

    fwd = jax.jit(custom_mlp_forward)
    out = fwd(x, prepared)
    out = jax.block_until_ready(out)

    # Pure-JAX f32 reference check (bf16 matmul inputs -> loose tolerance).
    w1, b1, w2, b2, w3, b3 = params
    xr = x.reshape(x.shape[0], -1)
    ref = jnp.maximum(xr @ w1 + b1, 0.0)
    ref = jnp.maximum(ref @ w2 + b2, 0.0)
    ref = ref @ w3 + b3
    assert out.shape == (2, 10)
    assert jnp.allclose(out, ref, atol=2e-2, rtol=2e-2)

    print("KERNEL_OK")
</pallas_src>

<mosaic_0001>
module attributes {stable_mosaic.version = 11 : i64} {
  func.func @mlp_kernel(%arg0: i32, %arg1: memref<8x256xbf16, #tpu.memory_space<vmem>>, %arg2: memref<256x128xbf16, #tpu.memory_space<vmem>>, %arg3: memref<1x128xf32, #tpu.memory_space<vmem>>, %arg4: memref<128x64xbf16, #tpu.memory_space<vmem>>, %arg5: memref<1x64xf32, #tpu.memory_space<vmem>>, %arg6: memref<64x16xbf16, #tpu.memory_space<vmem>>, %arg7: memref<1x16xf32, #tpu.memory_space<vmem>>, %arg8: memref<8x16xf32, #tpu.memory_space<vmem>>) attributes {dimension_semantics = [#tpu.dimension_semantics<parallel>], iteration_bounds = array<i64: 1>, scalar_prefetch = 0 : i64, scratch_operands = 0 : i64, tpu.core_type = #tpu.core_type<tc>, window_params = [{transform_indices = @transform_0, window_bounds = array<i64: 8, 256>}, {pipeline_mode = #tpu.pipeline_mode<synchronous>, transform_indices = @transform_1, window_bounds = array<i64: 256, 128>}, {pipeline_mode = #tpu.pipeline_mode<synchronous>, transform_indices = @transform_2, window_bounds = array<i64: 1, 128>}, {pipeline_mode = #tpu.pipeline_mode<synchronous>, transform_indices = @transform_3, window_bounds = array<i64: 128, 64>}, {pipeline_mode = #tpu.pipeline_mode<synchronous>, transform_indices = @transform_4, window_bounds = array<i64: 1, 64>}, {pipeline_mode = #tpu.pipeline_mode<synchronous>, transform_indices = @transform_5, window_bounds = array<i64: 64, 16>}, {pipeline_mode = #tpu.pipeline_mode<synchronous>, transform_indices = @transform_6, window_bounds = array<i64: 1, 16>}, {transform_indices = @transform_7, window_bounds = array<i64: 8, 16>}]} {
    %c0 = arith.constant 0 : index
    %c0_0 = arith.constant 0 : index
    %0 = vector.load %arg1[%c0, %c0_0] : memref<8x256xbf16, #tpu.memory_space<vmem>>, vector<8x256xbf16>
    %c0_1 = arith.constant 0 : index
    %c0_2 = arith.constant 0 : index
    %1 = vector.load %arg2[%c0_1, %c0_2] : memref<256x128xbf16, #tpu.memory_space<vmem>>, vector<256x128xbf16>
    %cst = arith.constant dense<0.000000e+00> : vector<8x128xf32>
    %2 = tpu.matmul %0, %1, %cst {dimension_numbers = #tpu.dot_dimension_numbers<[1], [0], [0], [1], [0, 0, 1, 1], [], []>} : vector<8x256xbf16>, vector<256x128xbf16>, vector<8x128xf32> -> vector<8x128xf32>
    %c0_3 = arith.constant 0 : index
    %c0_4 = arith.constant 0 : index
    %3 = vector.load %arg3[%c0_3, %c0_4] : memref<1x128xf32, #tpu.memory_space<vmem>>, vector<1x128xf32>
    %4 = vector.broadcast %3 : vector<1x128xf32> to vector<8x128xf32>
    %5 = arith.addf %2, %4 : vector<8x128xf32>
    %cst_5 = arith.constant 0.000000e+00 : f32
    %6 = vector.broadcast %cst_5 : f32 to vector<8x128xf32>
    %7 = arith.maximumf %5, %6 : vector<8x128xf32>
    %8 = arith.truncf %7 : vector<8x128xf32> to vector<8x128xbf16>
    %c0_6 = arith.constant 0 : index
    %c0_7 = arith.constant 0 : index
    %9 = vector.load %arg4[%c0_6, %c0_7] : memref<128x64xbf16, #tpu.memory_space<vmem>>, vector<128x64xbf16>
    %cst_8 = arith.constant dense<0.000000e+00> : vector<8x64xf32>
    %10 = tpu.matmul %8, %9, %cst_8 {dimension_numbers = #tpu.dot_dimension_numbers<[1], [0], [0], [1], [0, 0, 1, 1], [], []>} : vector<8x128xbf16>, vector<128x64xbf16>, vector<8x64xf32> -> vector<8x64xf32>
    %c0_9 = arith.constant 0 : index
    %c0_10 = arith.constant 0 : index
    %11 = vector.load %arg5[%c0_9, %c0_10] : memref<1x64xf32, #tpu.memory_space<vmem>>, vector<1x64xf32>
    %12 = vector.broadcast %11 : vector<1x64xf32> to vector<8x64xf32>
    %13 = arith.addf %10, %12 : vector<8x64xf32>
    %cst_11 = arith.constant 0.000000e+00 : f32
    %14 = vector.broadcast %cst_11 : f32 to vector<8x64xf32>
    %15 = arith.maximumf %13, %14 : vector<8x64xf32>
    %16 = arith.truncf %15 : vector<8x64xf32> to vector<8x64xbf16>
    %c0_12 = arith.constant 0 : index
    %c0_13 = arith.constant 0 : index
    %17 = vector.load %arg6[%c0_12, %c0_13] : memref<64x16xbf16, #tpu.memory_space<vmem>>, vector<64x16xbf16>
    %cst_14 = arith.constant dense<0.000000e+00> : vector<8x16xf32>
    %18 = tpu.matmul %16, %17, %cst_14 {dimension_numbers = #tpu.dot_dimension_numbers<[1], [0], [0], [1], [0, 0, 1, 1], [], []>} : vector<8x64xbf16>, vector<64x16xbf16>, vector<8x16xf32> -> vector<8x16xf32>
    %c0_15 = arith.constant 0 : index
    %c0_16 = arith.constant 0 : index
    %19 = vector.load %arg7[%c0_15, %c0_16] : memref<1x16xf32, #tpu.memory_space<vmem>>, vector<1x16xf32>
    %20 = vector.broadcast %19 : vector<1x16xf32> to vector<8x16xf32>
    %21 = arith.addf %18, %20 : vector<8x16xf32>
    %c0_17 = arith.constant 0 : index
    %c0_18 = arith.constant 0 : index
    %22 = vector.load %arg8[%c0_17, %c0_18] : memref<8x16xf32, #tpu.memory_space<vmem>>, vector<8x16xf32>
    tpu.vector_store %arg8[%c0_17, %c0_18], %21 {strides = array<i32>} : memref<8x16xf32, #tpu.memory_space<vmem>>, vector<8x16xf32>,
    return
  }
  func.func @transform_0(%arg0: i32) -> (i32, i32) {
    %c0_i32 = arith.constant 0 : i32
    %c0_i32_0 = arith.constant 0 : i32
    return %arg0, %c0_i32 : i32, i32
  }
  func.func @transform_1(%arg0: i32) -> (i32, i32) {
    %c0_i32 = arith.constant 0 : i32
    %c0_i32_0 = arith.constant 0 : i32
    %c0_i32_1 = arith.constant 0 : i32
    return %c0_i32, %c0_i32_0 : i32, i32
  }
  func.func @transform_2(%arg0: i32) -> (i32, i32) {
    %c0_i32 = arith.constant 0 : i32
    %c0_i32_0 = arith.constant 0 : i32
    %c0_i32_1 = arith.constant 0 : i32
    return %c0_i32, %c0_i32_0 : i32, i32
  }
  func.func @transform_3(%arg0: i32) -> (i32, i32) {
    %c0_i32 = arith.constant 0 : i32
    %c0_i32_0 = arith.constant 0 : i32
    %c0_i32_1 = arith.constant 0 : i32
    return %c0_i32, %c0_i32_0 : i32, i32
  }
  func.func @transform_4(%arg0: i32) -> (i32, i32) {
    %c0_i32 = arith.constant 0 : i32
    %c0_i32_0 = arith.constant 0 : i32
    %c0_i32_1 = arith.constant 0 : i32
    return %c0_i32, %c0_i32_0 : i32, i32
  }
  func.func @transform_5(%arg0: i32) -> (i32, i32) {
    %c0_i32 = arith.constant 0 : i32
    %c0_i32_0 = arith.constant 0 : i32
    %c0_i32_1 = arith.constant 0 : i32
    return %c0_i32, %c0_i32_0 : i32, i32
  }
  func.func @transform_6(%arg0: i32) -> (i32, i32) {
    %c0_i32 = arith.constant 0 : i32
    %c0_i32_0 = arith.constant 0 : i32
    %c0_i32_1 = arith.constant 0 : i32
    return %c0_i32, %c0_i32_0 : i32, i32
  }
  func.func @transform_7(%arg0: i32) -> (i32, i32) {
    %c0_i32 = arith.constant 0 : i32
    %c0_i32_0 = arith.constant 0 : i32
    return %arg0, %c0_i32 : i32, i32
  }
}

</mosaic_0001>

<bundles_post_ra>
// kernel: custom_mlp_forward.1
= control target key start
LH: loop header
LB: loop body
LE: loop exit
PB: predicated region body
PF: predicated region fallthrough
CT: control target
= control target key end

     0   :  { %v548_v1 = vmov 0.0   ;;  %vm549_vm0 = vmmov 0   ;;  %vm364_vm1 = vcmask 523264   ;;  %vm408_vm2 = vcmask 130048   ;;  %s703_s1 = inlined_call_operand.vmem [shape: bf16[256,128], index: 1, kind: input, shape index: {}]   ;;  %s704_s0 = inlined_call_operand.vmem [shape: bf16[8,256], index: 0, kind: input, shape index: {}]   ;;  %s705_s3 = inlined_call_operand.vmem [shape: bf16[128,64], index: 3, kind: input, shape index: {}]   ;;  %s706_s5 = inlined_call_operand.vmem [shape: bf16[64,16], index: 5, kind: input, shape index: {}]   ;;  %s707_s2 = inlined_call_operand.vmem [shape: f32[1,128], index: 2, kind: input, shape index: {}]   ;;  %s708_s4 = inlined_call_operand.vmem [shape: f32[1,64], index: 4, kind: input, shape index: {}]   ;;  %s709_s6 = inlined_call_operand.vmem [shape: f32[1,16], index: 6, kind: input, shape index: {}]   ;;  %s710_s7 = inlined_call_operand.vmem [shape: f32[8,16], index: 7, kind: output, shape index: {}]  }
   0x1   :  { %v518_v0 = vld [vmem:[%s703_s1 + $0x40] sm:$0xff]   ;;  %484 = vmatprep.subr.bf16.mxu1 %v548_v1  ;;  %v520_v3 = vld [vmem:[%s703_s1 + $0x48] sm:$0xff]   ;;  %v522_v5 = vld [vmem:[%s703_s1 + $0x50] sm:$0xff]   ;;  %500 = vmatprep.mubr.msk.bf16.mxu1 %vm549_vm0, %v548_v1 }
   0x2   :  { %v519_v2 = vld [vmem:[%s703_s1] sm:$0xff]   ;;  %448 = vmatprep.subr.bf16.mxu0 %v518_v0  ;;  %v521_v4 = vld [vmem:[%s703_s1 + $0x8] sm:$0xff]   ;;  %v523_v6 = vld [vmem:[%s703_s1 + $0x10] sm:$0xff]  }
   0x3   :  { %449 = vmatpush3.bf16.msra.mxu0 %v519_v2  ;;  %v524_v7 = vld [vmem:[%s703_s1 + $0x58] sm:$0xff]   ;;  %v526_v9 = vld [vmem:[%s703_s1 + $0x60] sm:$0xff]   ;;  %v528_v11 = vld [vmem:[%s703_s1 + $0x68] sm:$0xff]  }
   0x4   :  { %450 = vmatprep.subr.bf16.mxu0 %v520_v3  ;;  %v525_v8 = vld [vmem:[%s703_s1 + $0x18] sm:$0xff]   ;;  %v527_v10 = vld [vmem:[%s703_s1 + $0x20] sm:$0xff]   ;;  %v529_v15 = vld [vmem:[%s703_s1 + $0x28] sm:$0xff]  }
   0x5   :  { %v27_v12 = vld [vmem:[%s704_s0] sm:$0xff]  ;;  %v530_v16 = vld [vmem:[%s703_s1 + $0x70] sm:$0xff]   ;;  %v537_v17 = vld [vmem:[%s705_s3 + $0x8] sm:$0xff]  }
   0x6   :  { %v416_v13 = vcombine.high %v27_v12, %v27_v12  ;;  %v536_v14 = vld [vmem:[%s705_s3] sm:$0xff]   ;;  %v531_v18 = vld [vmem:[%s703_s1 + $0x30] sm:$0xff]   ;;  %v532_v19 = vld [vmem:[%s703_s1 + $0x78] sm:$0xff]   ;;  %v415_v23 = vcombine.low %v27_v12, %v27_v12 }
   0x7   :  { %451 = vmatpush3.bf16.msra.mxu0 %v521_v4  ;;  %485 = vmatpush3.bf16.msra.mxu1 %v536_v14  ;;  %v538_v20 = vld [vmem:[%s705_s3 + $0x10] sm:$0xff]   ;;  %v533_v21 = vld [vmem:[%s703_s1 + $0x38] sm:$0xff]   ;;  %v540_v24 = vld [vmem:[%s705_s3 + $0x20] sm:$0xff]  }
   0x8   :  { %452 = vmatprep.subr.bf16.mxu0 %v522_v5  ;;  %202 = vmatprep.mubr.bf16.mxu0 %v416_v13  ;;  %v539_v22 = vld [vmem:[%s705_s3 + $0x18] sm:$0xff]   ;;  %v541_v25 = vld [vmem:[%s705_s3 + $0x28] sm:$0xff]   ;;  %v542_v26 = vld [vmem:[%s705_s3 + $0x30] sm:$0xff]  }
   0x9   :  { %486 = vmatprep.subr.bf16.mxu1 %v548_v1  ;;  %v543_v27 = vld [vmem:[%s705_s3 + $0x38] sm:$0xff]   ;;  %v544_v28 = vld [vmem:[%s706_s5] sm:$0xff]   ;;  %v545_v29 = vld [vmem:[%s706_s5 + $0x8] sm:$0xff]  }
   0xa   :  { %v414_v31 = vld [vmem:[%s707_s2] ss:$0 sm:$0xff]  ;;  %v546_v39 = vld [vmem:[%s706_s5 + $0x10] sm:$0xff]   ;;  %v547_v40 = vld [vmem:[%s706_s5 + $0x18] sm:$0xff]  }
   0xb   :  { %453 = vmatpush3.bf16.msra.mxu0 %v523_v6  ;;  %487 = vmatpush3.bf16.msra.mxu1 %v537_v17  ;;  %v433_v41 = vld [vmem:[%s708_s4] ss:$0 sm:$0xff] }
   0xc   :  { %454 = vmatprep.subr.bf16.mxu0 %v524_v7  ;;  %488 = vmatprep.subr.bf16.mxu1 %v548_v1  ;;  %v442_v49 = vld [vmem:[%s709_s6] ss:$0 sm:$0xff] }
   0xf   :  { %455 = vmatpush3.bf16.msra.mxu0 %v525_v8  ;;  %489 = vmatpush3.bf16.msra.mxu1 %v538_v20 }
  0x10   :  { %456 = vmatprep.subr.bf16.mxu0 %v526_v9  ;;  %490 = vmatprep.subr.bf16.mxu1 %v548_v1 }
  0x13   :  { %457 = vmatpush3.bf16.msra.mxu0 %v527_v10  ;;  %491 = vmatpush3.bf16.msra.mxu1 %v539_v22 }
  0x14   :  { %458 = vmatprep.subr.bf16.mxu0 %v528_v11  ;;  %492 = vmatprep.subr.bf16.mxu1 %v548_v1 }
  0x17   :  { %459 = vmatpush3.bf16.msra.mxu0 %v529_v15  ;;  %493 = vmatpush3.bf16.msra.mxu1 %v540_v24 }
  0x18   :  { %460 = vmatprep.subr.bf16.mxu0 %v530_v16  ;;  %494 = vmatprep.subr.bf16.mxu1 %v548_v1 }
  0x1b   :  { %461 = vmatpush3.bf16.msra.mxu0 %v531_v18  ;;  %495 = vmatpush3.bf16.msra.mxu1 %v541_v25 }
  0x1c   :  { %462 = vmatprep.subr.bf16.mxu0 %v532_v19  ;;  %496 = vmatprep.subr.bf16.mxu1 %v548_v1 }
  0x1f   :  { %463 = vmatpush3.bf16.msra.mxu0 %v533_v21  ;;  %497 = vmatpush3.bf16.msra.mxu1 %v542_v26 }
  0x20   :  { %504 = vmatprep.subr.bf16.mxu0 %v548_v1  ;;  %498 = vmatprep.subr.bf16.mxu1 %v548_v1 }
  0x22   :  { %203 = vmatmul.mubr.bf16.vlgmr.msra.gmra.mrb[0].mxu0 %v415_v23 }
  0x23   :  { %499 = vmatpush3.bf16.msra.mxu1 %v543_v27  ;;  %512 = vmatprep.mubr.msk.bf16.mxu0 %vm549_vm0, %v548_v1 }
  0x24   :  { %505 = vmatpush3.bf16.msra.mxu0 %v544_v28 }
  0x25   :  { %506 = vmatprep.subr.bf16.mxu0 %v548_v1 }
  0x28   :  { %507 = vmatpush3.bf16.msra.mxu0 %v545_v29 }
  0x29   :  { %508 = vmatprep.subr.bf16.mxu0 %v548_v1 }
  0x2c   :  { %509 = vmatpush3.bf16.msra.mxu0 %v546_v39 }
  0x2d   :  { %510 = vmatprep.subr.bf16.mxu0 %v548_v1 }
  0x30   :  { %511 = vmatpush3.bf16.msra.mxu0 %v547_v40 }
  0xf5   :  { %v464_v30 = vpop.f32.mrb[0].mxu0 }
  0xf6   :  { %v465_v32 = vpop.f32.mrb[1].mxu0 }
  0xf7   :  { %v466_v33 = vadd.f32 %v465_v32, %v464_v30  ;;  %v467_v34 = vpop.f32.mrb[2].mxu0 }
  0xf8   :  { %v468_v35 = vpop.f32.mrb[3].mxu0 }
  0xf9   :  { %v205_v36 = vadd.f32 %v466_v33, %v414_v31 }
  0xfb   :  { %v210_v37 = vmax.f32 %v205_v36, 0.0 }
  0xfd   :  { %v211_v38 = vpack.c.bf16 %v210_v37, %v210_v37 }
  0xff   :  { %501 = vmatmul.mubr.bf16.vlgmr.msra.gmra.mrb[0].mxu1 %v211_v38 }
 0x1d2   :  { %v317_v42 = vpop.f32.mrb[0].mxu1 }
 0x1d3   :  { %v318_v43 = vadd.f32 %v433_v41, %v317_v42  ;;  %v502_v44 = vpop.f32.mrb[1].mxu1 }
 0x1d4   :  { %v320_v45 = vpop.f32.mrb[2].mxu1 }
 0x1d5   :  { %v323_v46 = vmax.f32 %v318_v43, 0.0  ;;  %v503_v47 = vpop.f32.mrb[3].mxu1 }
 0x1d7   :  { %v324_v48 = vpack.c.bf16 %v323_v46, %v323_v46 }
 0x1d9   :  { %513 = vmatmul.mubr.msk.bf16.vlgmr.msra.gmra.mrb[4].mxu0 %vm364_vm1, %v324_v48 }
 0x2ac   :  { %v402_v50 = vpop.f32.mrb[4].mxu0 }
 0x2ad   :  { %v403_v51 = vadd.f32 %v442_v49, %v402_v50  ;;  %v514_v52 = vpop.f32.mrb[5].mxu0 }
 0x2ae   :  { %v405_v53 = vpop.f32.mrb[6].mxu0 }
 0x2af   :  { %409 = vst.msk [vmem:[%s710_s7] sm:$0xff] %vm408_vm2, %v403_v51  ;;  %v515_v54 = vpop.f32.mrb[7].mxu0 }

</bundles_post_ra>
